<compile_context>
chip_gen: v7x
topology: tpu7x:2x2x1
jax: 0.10.0
libtpu: 0.0.40
codegen_flags: <defaults>
</compile_context>

<pallas_src>
import jax
import jax.numpy as jnp
from jax.experimental import pallas as pl
from jax.experimental.pallas import tpu as pltpu


def _make_identity_kernel(chunks):
    """Build a kernel that copies x -> o with one HBM->HBM DMA per chunk.

    `chunks` is a static Python list of (start, size) pairs along the leading
    axis (computed at trace time), so every slice below is static.
    """

    def kernel(x_ref, o_ref, sems):
        copies = []
        if len(chunks) == 1:
            # Common case: one DMA of the whole array, no slicing at all.
            copies.append(pltpu.make_async_copy(x_ref, o_ref, sems.at[0]))
            copies[0].start()
        else:
            for i, (start, size) in enumerate(chunks):
                cp = pltpu.make_async_copy(
                    x_ref.at[pl.ds(start, size)],
                    o_ref.at[pl.ds(start, size)],
                    sems.at[i],
                )
                cp.start()
                copies.append(cp)
        # Wait for all outstanding DMAs before the kernel returns.
        for cp in copies:
            cp.wait()

    return kernel


def identity(x: jax.Array, *, max_dma_chunks: int = 4) -> jax.Array:
    """Pallas implementation of nn.Identity: returns a copy of x (same shape/dtype)."""
    orig_shape = x.shape
    # 0-d arrays: give the DMA at least one axis.
    x_nd = x.reshape(1) if x.ndim == 0 else x

    lead = x_nd.shape[0]
    nbytes = x_nd.size * x_nd.dtype.itemsize

    # Only split when the transfer is big enough that concurrent DMA engines
    # help; otherwise a single whole-array DMA is cheapest.
    if nbytes >= (8 << 20) and lead >= 2:
        num_chunks = min(max_dma_chunks, lead)
    else:
        num_chunks = 1

    # Static, roughly equal chunk boundaries along the leading axis.
    base, rem = divmod(lead, num_chunks)
    chunks = []
    start = 0
    for i in range(num_chunks):
        size = base + (1 if i < rem else 0)
        chunks.append((start, size))
        start += size

    y = pl.pallas_call(
        _make_identity_kernel(chunks),
        out_shape=jax.ShapeDtypeStruct(x_nd.shape, x_nd.dtype),
        in_specs=[pl.BlockSpec(memory_space=pl.ANY)],   # stay in HBM, no auto-DMA
        out_specs=pl.BlockSpec(memory_space=pl.ANY),    # written directly by DMA
        scratch_shapes=[pltpu.SemaphoreType.DMA((num_chunks,))],
    )(x_nd)

    return y.reshape(orig_shape)


if __name__ == "__main__":
    key = jax.random.PRNGKey(0)
    # NCHW input as the PyTorch module would see it: batch=2, channels=4, 16x16.
    x = jax.random.normal(key, (2, 4, 16, 16), dtype=jnp.float32)

    y = identity(x)
    jax.block_until_ready(y)
    assert y.shape == x.shape, (y.shape, x.shape)
    assert y.dtype == x.dtype, (y.dtype, x.dtype)
    assert bool(jnp.all(y == x)), "Identity output mismatch"

    # Odd (non-128-multiple) shape to exercise the shape-agnostic DMA path.
    x2 = jax.random.normal(jax.random.PRNGKey(1), (3, 5, 7), dtype=jnp.float32)
    y2 = identity(x2)
    jax.block_until_ready(y2)
    assert y2.shape == x2.shape and y2.dtype == x2.dtype
    assert bool(jnp.all(y2 == x2)), "Identity output mismatch (odd shape)"

    print("KERNEL_OK")
</pallas_src>

<mosaic_0001>
module attributes {stable_mosaic.version = 11 : i64} {
  func.func @kernel(%arg0: memref<2x4x16x16xf32, #tpu.memory_space<any>>, %arg1: memref<2x4x16x16xf32, #tpu.memory_space<any>>, %arg2: memref<1x!tpu.dma_semaphore, #tpu.memory_space<semaphore_mem>>) attributes {dimension_semantics = [], scalar_prefetch = 0 : i64, scratch_operands = 1 : i64, tpu.core_type = #tpu.core_type<tc>} {
    %c0_i32 = arith.constant 0 : i32
    %0 = tpu.memref_slice %arg2[%c0_i32] : memref<1x!tpu.dma_semaphore, #tpu.memory_space<semaphore_mem>> -> memref<1x!tpu.dma_semaphore, #tpu.memory_space<semaphore_mem>>
    %1 = tpu.memref_squeeze %0 : memref<1x!tpu.dma_semaphore, #tpu.memory_space<semaphore_mem>> -> memref<!tpu.dma_semaphore, #tpu.memory_space<semaphore_mem>>
    tpu.enqueue_dma source(%arg0 : memref<2x4x16x16xf32, #tpu.memory_space<any>>) target(%arg1 : memref<2x4x16x16xf32, #tpu.memory_space<any>>) target_semaphore(%1 : memref<!tpu.dma_semaphore, #tpu.memory_space<semaphore_mem>>)
    %c0_i32_0 = arith.constant 0 : i32
    %2 = tpu.memref_slice %arg2[%c0_i32_0] : memref<1x!tpu.dma_semaphore, #tpu.memory_space<semaphore_mem>> -> memref<1x!tpu.dma_semaphore, #tpu.memory_space<semaphore_mem>>
    %3 = tpu.memref_squeeze %2 : memref<1x!tpu.dma_semaphore, #tpu.memory_space<semaphore_mem>> -> memref<!tpu.dma_semaphore, #tpu.memory_space<semaphore_mem>>
    tpu.wait_dma2 semaphore(%3 : memref<!tpu.dma_semaphore, #tpu.memory_space<semaphore_mem>>) src(%arg0 : memref<2x4x16x16xf32, #tpu.memory_space<any>>) dst(%arg1 : memref<2x4x16x16xf32, #tpu.memory_space<any>>)
    return
  }
}

</mosaic_0001>

<bundles_post_ra>
// kernel: tpu_custom_call.1
= control target key start
LH: loop header
LB: loop body
LE: loop exit
PB: predicated region body
PF: predicated region fallthrough
CT: control target
= control target key end

     0   :  { %s36_s6 = smov [#allocation2]   ;;  %s37_s7 = smov [#allocation3]   ;;  %s55_s0 = inlined_call_operand.hbm [shape: f32[2,4,16,16], index: 0, kind: input, shape index: {}]   ;;  %s56_s1 = inlined_call_operand.hbm [shape: f32[2,4,16,16], index: 1, kind: output, shape index: {}]  }
   0x1   :  { %s38_s8 = smov 0  }
   0x2   :  { %18 = dma.general %s55_s0, 2048, %s56_s1, %s36_s6, %s37_s7, [#allocation4], %s38_s8, 0  }
   0x3   :  { %34 = dma.done.wait [#allocation2], 2048 }
   0x4   :  { %35 = vsyncadd [#allocation2], 4294965248 }
   0x5   :  { %24 = vsyncmov [#allocation2] }
   0x8   :  { %s25_s13 = vpop.sfrf %24 }
   0x9   :  { %p30_p0 = scmp.ne.s32.totalorder %s25_s13, 0 }
   0xb   :  { %29 = shalt.err (%p30_p0)  }

</bundles_post_ra>
